<compile_context>
chip_gen: v7x
topology: tpu7x:2x2x1
jax: 0.10.0
libtpu: 0.0.40
codegen_flags: <defaults>
</compile_context>

<pallas_src>
import functools

import jax
import jax.numpy as jnp
from jax.experimental import pallas as pl
from jax.experimental.pallas import tpu as pltpu

NODES = 16       # small synthetic size for the test (module default is 150)
C_HID = 8        # E2E hidden channels
C_OUT = 256      # E2N output channels
SLOPE = 0.33     # LeakyReLU negative slope
OUT_BLOCK = 128  # output-channel block per grid step (lane dense; 2 blocks -> 2 TCs on v7x)


def _leaky(x):
    return jnp.where(x >= 0, x, SLOPE * x)


def _round_up(x, m):
    return (x + m - 1) // m * m


def nac_kernel(a_ref, at_ref, w1a_ref, b1a_ref, w1b_ref, b1b_ref,
               w2a_ref, b2a_ref, w2b_ref, b2b_ref, w3t_ref, b3_ref, y_ref):
    """One 128-wide output-channel block of the full forward pass (all in VMEM)."""
    n = a_ref.shape[0]          # padded node count (multiple of 8)
    c = w1a_ref.shape[0]        # 8 hidden channels

    # ---------------- E2E #1 (1 -> 8 channels) ----------------
    # a1[o, j] = sum_k W1a[o, k] A[k, j];  b1[o, i] = sum_k W1b[o, k] A[i, k]
    a1 = jnp.dot(w1a_ref[...], a_ref[...],
                 preferred_element_type=jnp.float32) + b1a_ref[...]        # (8, n)
    b1 = jnp.dot(w1b_ref[...], at_ref[...],
                 preferred_element_type=jnp.float32) + b1b_ref[...]        # (8, n)

    # x1[c, i, j] = leaky(a1[c, j] + b1[c, i]); build both stacked layouts with a
    # single fused broadcast + leaky each (flatten is free since n % 8 == 0).
    x1_stack = _leaky(b1[:, :, None] + a1[:, None, :]).reshape(c * n, n)    # [c*n+k, j] = x1[c,k,j]
    x1_stack_t = _leaky(a1[:, :, None] + b1[:, None, :]).reshape(c * n, n)  # [c*n+k, i] = x1[c,i,k]

    # ---------------- E2E #2 (8 -> 8 channels): single K = 8n matmuls ----------------
    a2 = jnp.dot(w2a_ref[...], x1_stack.astype(jnp.bfloat16),
                 preferred_element_type=jnp.float32) + b2a_ref[...]        # (8, n)
    b2 = jnp.dot(w2b_ref[...], x1_stack_t.astype(jnp.bfloat16),
                 preferred_element_type=jnp.float32) + b2b_ref[...]        # (8, n)

    # x2[c, i, k] = leaky(a2[c, k] + b2[c, i]); E2N only needs the "wide" layout,
    # reached with one 2-D XLU transpose (the XLU is otherwise idle here).
    x2_stack_t = _leaky(a2[:, :, None] + b2[:, None, :]).reshape(c * n, n)  # [c*n+k, i]
    x2_wide = x2_stack_t.T                                                  # (n, 8n): [i, c*n+k]

    # ---------------- E2N (8 -> 256), this output block: K = 8n matmul ----------------
    # Lane-dense (n, 128) result => unmasked stores.
    y = jnp.dot(x2_wide.astype(jnp.bfloat16), w3t_ref[...],
                preferred_element_type=jnp.float32) + b3_ref[...]
    y_ref[...] = _leaky(y)


def init_params(key, nodes):
    """Deterministic synthetic parameters (shapes implied by the nn.Module)."""
    ks = jax.random.split(key, 10)
    s = 0.1
    return {
        # E2E #1: conv1xd (8,1,nodes,1) -> (8,1,nodes);  convdx1 (8,1,1,nodes) -> (8,1,nodes)
        "w1a": jax.random.normal(ks[0], (C_HID, 1, nodes), jnp.float32) * s,
        "b1a": jax.random.normal(ks[1], (C_HID,), jnp.float32) * s,
        "w1b": jax.random.normal(ks[2], (C_HID, 1, nodes), jnp.float32) * s,
        "b1b": jax.random.normal(ks[3], (C_HID,), jnp.float32) * s,
        # E2E #2: (8,8,nodes) each
        "w2a": jax.random.normal(ks[4], (C_HID, C_HID, nodes), jnp.float32) * s,
        "b2a": jax.random.normal(ks[5], (C_HID,), jnp.float32) * s,
        "w2b": jax.random.normal(ks[6], (C_HID, C_HID, nodes), jnp.float32) * s,
        "b2b": jax.random.normal(ks[7], (C_HID,), jnp.float32) * s,
        # E2N: conv (256,8,1,nodes) -> (256,8,nodes)
        "w3": jax.random.normal(ks[8], (C_OUT, C_HID, nodes), jnp.float32) * s,
        "b3": jax.random.normal(ks[9], (C_OUT,), jnp.float32) * s,
    }


def prepare_params(params, nodes):
    """One-time parameter plumbing (hoisted out of the jitted forward): pad the node
    dim to a multiple of 8, flatten conv weights into matmul-ready 2-D layouts, cast
    matmul operands to bf16 (biases stay f32)."""
    np_ = _round_up(nodes, 8)

    def pad_last(x):
        p = np_ - x.shape[-1]
        return x if p == 0 else jnp.pad(x, [(0, 0)] * (x.ndim - 1) + [(0, p)])

    f32, bf16 = jnp.float32, jnp.bfloat16
    return {
        "w1a": pad_last(params["w1a"][:, 0, :]).astype(bf16),                      # (8, Np)
        "b1a": params["b1a"].reshape(C_HID, 1).astype(f32),
        "w1b": pad_last(params["w1b"][:, 0, :]).astype(bf16),                      # (8, Np)
        "b1b": params["b1b"].reshape(C_HID, 1).astype(f32),
        "w2a": pad_last(params["w2a"]).reshape(C_HID, C_HID * np_).astype(bf16),   # (8, 8Np)
        "b2a": params["b2a"].reshape(C_HID, 1).astype(f32),
        "w2b": pad_last(params["w2b"]).reshape(C_HID, C_HID * np_).astype(bf16),   # (8, 8Np)
        "b2b": params["b2b"].reshape(C_HID, 1).astype(f32),
        "w3t": pad_last(params["w3"]).reshape(C_OUT, C_HID * np_).T.astype(bf16),  # (8Np, 256)
        "b3": params["b3"].reshape(1, C_OUT).astype(f32),
    }


@functools.partial(jax.jit, static_argnames=("nodes",))
def node_alignment_choose(A, prepped, nodes=NODES):
    n = nodes
    np_ = _round_up(n, 8)
    assert np_ % 8 == 0 and C_OUT % OUT_BLOCK == 0
    n_blk = C_OUT // OUT_BLOCK

    # Input plumbing: zero-pad A to the sublane-aligned node count, cast to bf16, and
    # pass both A and A^T so the kernel needs no transpose of the input.
    a2 = A.reshape(n, n).astype(jnp.float32)           # torch: A.view(1, 1, nodes, nodes)
    a2 = jnp.pad(a2, ((0, np_ - n), (0, np_ - n)))
    a_bf = a2.astype(jnp.bfloat16)
    at_bf = a2.T.astype(jnp.bfloat16)

    def full(shape):
        return pl.BlockSpec(shape, lambda i: (0,) * len(shape))

    in_specs = [
        full((np_, np_)),                                           # A
        full((np_, np_)),                                           # A^T
        full((C_HID, np_)),                                         # w1a
        full((C_HID, 1)),                                           # b1a
        full((C_HID, np_)),                                         # w1b
        full((C_HID, 1)),                                           # b1b
        full((C_HID, C_HID * np_)),                                 # w2a (flattened)
        full((C_HID, 1)),                                           # b2a
        full((C_HID, C_HID * np_)),                                 # w2b (flattened)
        full((C_HID, 1)),                                           # b2b
        pl.BlockSpec((C_HID * np_, OUT_BLOCK), lambda i: (0, i)),   # w3^T output block
        pl.BlockSpec((1, OUT_BLOCK), lambda i: (0, i)),             # b3 output block
    ]
    out_specs = pl.BlockSpec((np_, OUT_BLOCK), lambda i: (0, i))

    flops = (4 * C_HID * np_ * np_                       # E2E #1 matmuls
             + 4 * C_HID * C_HID * np_ * np_             # E2E #2 matmuls (K = 8Np)
             + 2 * np_ * C_HID * np_ * C_OUT)            # E2N matmul (K = 8Np)
    bytes_accessed = (2 * np_ * np_ * 2 + 2 * C_HID * np_ * 2
                      + 2 * C_HID * C_HID * np_ * 2 + C_HID * np_ * C_OUT * 2
                      + 4 * C_HID * 4 + C_OUT * 4 + np_ * C_OUT * 4)

    y_t = pl.pallas_call(
        nac_kernel,
        out_shape=jax.ShapeDtypeStruct((np_, C_OUT), jnp.float32),
        grid=(n_blk,),
        in_specs=in_specs,
        out_specs=out_specs,
        compiler_params=pltpu.CompilerParams(dimension_semantics=("parallel",)),
        cost_estimate=pl.CostEstimate(flops=flops, transcendentals=0,
                                      bytes_accessed=bytes_accessed),
    )(a_bf, at_bf,
      prepped["w1a"], prepped["b1a"], prepped["w1b"], prepped["b1b"],
      prepped["w2a"], prepped["b2a"], prepped["w2b"], prepped["b2b"],
      prepped["w3t"], prepped["b3"])

    # y_t[i, o] = y[o, i].  torch does x.reshape(nodes, -1) on the contiguous NCHW
    # (1, 256, nodes, 1) output, i.e. a raw row-major reshape of the (256, nodes) map.
    y = y_t[:n].T                      # (256, n)
    return y.reshape(n, -1)            # (n, 256), identical element order to PyTorch


def reference_forward(A, params, nodes=NODES):
    """Pure-JAX f32 replica of the PyTorch forward (for validation)."""
    N = nodes
    hp = jax.lax.Precision.HIGHEST
    x = A.reshape(1, N, N).astype(jnp.float32)

    def e2e(x, wa, ba, wb, bb):
        a = jnp.einsum("ock,ckj->oj", wa, x, precision=hp) + ba[:, None]   # conv (d,1)
        b = jnp.einsum("ock,cik->oi", wb, x, precision=hp) + bb[:, None]   # conv (1,d)
        return a[:, None, :] + b[:, :, None]                               # cat-broadcast + add

    x = _leaky(e2e(x, params["w1a"], params["b1a"], params["w1b"], params["b1b"]))
    x = _leaky(e2e(x, params["w2a"], params["b2a"], params["w2b"], params["b2b"]))
    y = jnp.einsum("ock,cik->oi", params["w3"], x, precision=hp) + params["b3"][:, None]
    y = _leaky(y)
    return y.reshape(N, -1)


if __name__ == "__main__":
    key = jax.random.PRNGKey(0)
    k_a, k_p = jax.random.split(key)
    params = init_params(k_p, NODES)
    A = jax.random.normal(k_a, (1, 1, NODES, NODES), jnp.float32)

    prepped = prepare_params(params, NODES)          # one-time, outside the jitted forward
    out = node_alignment_choose(A, prepped, nodes=NODES)
    out = jax.block_until_ready(out)

    ref = reference_forward(A, params, NODES)
    assert out.shape == (NODES, C_OUT), out.shape
    # Matmul operands are intentionally bf16 (f32 accumulate), hence slightly looser atol.
    if not jnp.allclose(out, ref, rtol=2e-2, atol=3e-2):
        raise AssertionError(
            f"mismatch: max abs err = {jnp.max(jnp.abs(out - ref))}")
    print("KERNEL_OK")
</pallas_src>

<mosaic_0001>
module attributes {stable_mosaic.version = 11 : i64} {
  func.func @nac_kernel(%arg0: i32, %arg1: memref<16x16xbf16, #tpu.memory_space<vmem>>, %arg2: memref<16x16xbf16, #tpu.memory_space<vmem>>, %arg3: memref<8x16xbf16, #tpu.memory_space<vmem>>, %arg4: memref<8x1xf32, #tpu.memory_space<vmem>>, %arg5: memref<8x16xbf16, #tpu.memory_space<vmem>>, %arg6: memref<8x1xf32, #tpu.memory_space<vmem>>, %arg7: memref<8x128xbf16, #tpu.memory_space<vmem>>, %arg8: memref<8x1xf32, #tpu.memory_space<vmem>>, %arg9: memref<8x128xbf16, #tpu.memory_space<vmem>>, %arg10: memref<8x1xf32, #tpu.memory_space<vmem>>, %arg11: memref<128x128xbf16, #tpu.memory_space<vmem>>, %arg12: memref<1x128xf32, #tpu.memory_space<vmem>>, %arg13: memref<16x128xf32, #tpu.memory_space<vmem>>) attributes {dimension_semantics = [#tpu.dimension_semantics<parallel>], iteration_bounds = array<i64: 2>, scalar_prefetch = 0 : i64, scratch_operands = 0 : i64, tpu.core_type = #tpu.core_type<tc>, window_params = [{pipeline_mode = #tpu.pipeline_mode<synchronous>, transform_indices = @transform_0, window_bounds = array<i64: 16, 16>}, {pipeline_mode = #tpu.pipeline_mode<synchronous>, transform_indices = @transform_1, window_bounds = array<i64: 16, 16>}, {pipeline_mode = #tpu.pipeline_mode<synchronous>, transform_indices = @transform_2, window_bounds = array<i64: 8, 16>}, {pipeline_mode = #tpu.pipeline_mode<synchronous>, transform_indices = @transform_3, window_bounds = array<i64: 8, 1>}, {pipeline_mode = #tpu.pipeline_mode<synchronous>, transform_indices = @transform_4, window_bounds = array<i64: 8, 16>}, {pipeline_mode = #tpu.pipeline_mode<synchronous>, transform_indices = @transform_5, window_bounds = array<i64: 8, 1>}, {pipeline_mode = #tpu.pipeline_mode<synchronous>, transform_indices = @transform_6, window_bounds = array<i64: 8, 128>}, {pipeline_mode = #tpu.pipeline_mode<synchronous>, transform_indices = @transform_7, window_bounds = array<i64: 8, 1>}, {pipeline_mode = #tpu.pipeline_mode<synchronous>, transform_indices = @transform_8, window_bounds = array<i64: 8, 128>}, {pipeline_mode = #tpu.pipeline_mode<synchronous>, transform_indices = @transform_9, window_bounds = array<i64: 8, 1>}, {transform_indices = @transform_10, window_bounds = array<i64: 128, 128>}, {transform_indices = @transform_11, window_bounds = array<i64: 1, 128>}, {transform_indices = @transform_12, window_bounds = array<i64: 16, 128>}]} {
    %c0 = arith.constant 0 : index
    %c0_0 = arith.constant 0 : index
    %0 = vector.load %arg3[%c0, %c0_0] : memref<8x16xbf16, #tpu.memory_space<vmem>>, vector<8x16xbf16>
    %c0_1 = arith.constant 0 : index
    %c0_2 = arith.constant 0 : index
    %1 = vector.load %arg1[%c0_1, %c0_2] : memref<16x16xbf16, #tpu.memory_space<vmem>>, vector<16x16xbf16>
    %cst = arith.constant dense<0.000000e+00> : vector<8x16xf32>
    %2 = tpu.matmul %0, %1, %cst {dimension_numbers = #tpu.dot_dimension_numbers<[1], [0], [0], [1], [0, 0, 1, 1], [], []>} : vector<8x16xbf16>, vector<16x16xbf16>, vector<8x16xf32> -> vector<8x16xf32>
    %c0_3 = arith.constant 0 : index
    %c0_4 = arith.constant 0 : index
    %3 = vector.load %arg4[%c0_3, %c0_4] : memref<8x1xf32, #tpu.memory_space<vmem>>, vector<8x1xf32>
    %4 = vector.broadcast %3 : vector<8x1xf32> to vector<8x16xf32>
    %5 = arith.addf %2, %4 : vector<8x16xf32>
    %c0_5 = arith.constant 0 : index
    %c0_6 = arith.constant 0 : index
    %6 = vector.load %arg5[%c0_5, %c0_6] : memref<8x16xbf16, #tpu.memory_space<vmem>>, vector<8x16xbf16>
    %c0_7 = arith.constant 0 : index
    %c0_8 = arith.constant 0 : index
    %7 = vector.load %arg2[%c0_7, %c0_8] : memref<16x16xbf16, #tpu.memory_space<vmem>>, vector<16x16xbf16>
    %cst_9 = arith.constant dense<0.000000e+00> : vector<8x16xf32>
    %8 = tpu.matmul %6, %7, %cst_9 {dimension_numbers = #tpu.dot_dimension_numbers<[1], [0], [0], [1], [0, 0, 1, 1], [], []>} : vector<8x16xbf16>, vector<16x16xbf16>, vector<8x16xf32> -> vector<8x16xf32>
    %c0_10 = arith.constant 0 : index
    %c0_11 = arith.constant 0 : index
    %9 = vector.load %arg6[%c0_10, %c0_11] : memref<8x1xf32, #tpu.memory_space<vmem>>, vector<8x1xf32>
    %10 = vector.broadcast %9 : vector<8x1xf32> to vector<8x16xf32>
    %11 = arith.addf %8, %10 : vector<8x16xf32>
    %12 = vector.shape_cast %11 : vector<8x16xf32> to vector<8x16x1xf32>
    %13 = vector.shape_cast %5 : vector<8x16xf32> to vector<8x1x16xf32>
    %14 = vector.broadcast %12 : vector<8x16x1xf32> to vector<8x16x16xf32>
    %15 = vector.broadcast %13 : vector<8x1x16xf32> to vector<8x16x16xf32>
    %16 = arith.addf %14, %15 : vector<8x16x16xf32>
    %cst_12 = arith.constant 0.000000e+00 : f32
    %17 = vector.broadcast %cst_12 : f32 to vector<8x16x16xf32>
    %18 = arith.cmpf oge, %16, %17 : vector<8x16x16xf32>
    %cst_13 = arith.constant 3.300000e-01 : f32
    %19 = vector.broadcast %cst_13 : f32 to vector<8x16x16xf32>
    %20 = arith.mulf %19, %16 : vector<8x16x16xf32>
    %21 = arith.select %18, %16, %20 : vector<8x16x16xi1>, vector<8x16x16xf32>
    %22 = vector.shape_cast %21 : vector<8x16x16xf32> to vector<128x16xf32>
    %23 = vector.shape_cast %5 : vector<8x16xf32> to vector<8x16x1xf32>
    %24 = vector.shape_cast %11 : vector<8x16xf32> to vector<8x1x16xf32>
    %25 = vector.broadcast %23 : vector<8x16x1xf32> to vector<8x16x16xf32>
    %26 = vector.broadcast %24 : vector<8x1x16xf32> to vector<8x16x16xf32>
    %27 = arith.addf %25, %26 : vector<8x16x16xf32>
    %cst_14 = arith.constant 0.000000e+00 : f32
    %28 = vector.broadcast %cst_14 : f32 to vector<8x16x16xf32>
    %29 = arith.cmpf oge, %27, %28 : vector<8x16x16xf32>
    %cst_15 = arith.constant 3.300000e-01 : f32
    %30 = vector.broadcast %cst_15 : f32 to vector<8x16x16xf32>
    %31 = arith.mulf %30, %27 : vector<8x16x16xf32>
    %32 = arith.select %29, %27, %31 : vector<8x16x16xi1>, vector<8x16x16xf32>
    %33 = vector.shape_cast %32 : vector<8x16x16xf32> to vector<128x16xf32>
    %c0_16 = arith.constant 0 : index
    %c0_17 = arith.constant 0 : index
    %34 = vector.load %arg7[%c0_16, %c0_17] : memref<8x128xbf16, #tpu.memory_space<vmem>>, vector<8x128xbf16>
    %35 = arith.truncf %22 : vector<128x16xf32> to vector<128x16xbf16>
    %cst_18 = arith.constant dense<0.000000e+00> : vector<8x16xf32>
    %36 = tpu.matmul %34, %35, %cst_18 {dimension_numbers = #tpu.dot_dimension_numbers<[1], [0], [0], [1], [0, 0, 1, 1], [], []>} : vector<8x128xbf16>, vector<128x16xbf16>, vector<8x16xf32> -> vector<8x16xf32>
    %c0_19 = arith.constant 0 : index
    %c0_20 = arith.constant 0 : index
    %37 = vector.load %arg8[%c0_19, %c0_20] : memref<8x1xf32, #tpu.memory_space<vmem>>, vector<8x1xf32>
    %38 = vector.broadcast %37 : vector<8x1xf32> to vector<8x16xf32>
    %39 = arith.addf %36, %38 : vector<8x16xf32>
    %c0_21 = arith.constant 0 : index
    %c0_22 = arith.constant 0 : index
    %40 = vector.load %arg9[%c0_21, %c0_22] : memref<8x128xbf16, #tpu.memory_space<vmem>>, vector<8x128xbf16>
    %41 = arith.truncf %33 : vector<128x16xf32> to vector<128x16xbf16>
    %cst_23 = arith.constant dense<0.000000e+00> : vector<8x16xf32>
    %42 = tpu.matmul %40, %41, %cst_23 {dimension_numbers = #tpu.dot_dimension_numbers<[1], [0], [0], [1], [0, 0, 1, 1], [], []>} : vector<8x128xbf16>, vector<128x16xbf16>, vector<8x16xf32> -> vector<8x16xf32>
    %c0_24 = arith.constant 0 : index
    %c0_25 = arith.constant 0 : index
    %43 = vector.load %arg10[%c0_24, %c0_25] : memref<8x1xf32, #tpu.memory_space<vmem>>, vector<8x1xf32>
    %44 = vector.broadcast %43 : vector<8x1xf32> to vector<8x16xf32>
    %45 = arith.addf %42, %44 : vector<8x16xf32>
    %46 = vector.shape_cast %39 : vector<8x16xf32> to vector<8x16x1xf32>
    %47 = vector.shape_cast %45 : vector<8x16xf32> to vector<8x1x16xf32>
    %48 = vector.broadcast %46 : vector<8x16x1xf32> to vector<8x16x16xf32>
    %49 = vector.broadcast %47 : vector<8x1x16xf32> to vector<8x16x16xf32>
    %50 = arith.addf %48, %49 : vector<8x16x16xf32>
    %cst_26 = arith.constant 0.000000e+00 : f32
    %51 = vector.broadcast %cst_26 : f32 to vector<8x16x16xf32>
    %52 = arith.cmpf oge, %50, %51 : vector<8x16x16xf32>
    %cst_27 = arith.constant 3.300000e-01 : f32
    %53 = vector.broadcast %cst_27 : f32 to vector<8x16x16xf32>
    %54 = arith.mulf %53, %50 : vector<8x16x16xf32>
    %55 = arith.select %52, %50, %54 : vector<8x16x16xi1>, vector<8x16x16xf32>
    %56 = vector.shape_cast %55 : vector<8x16x16xf32> to vector<128x16xf32>
    %57 = tpu.transpose %56, [1, 0] : vector<128x16xf32> -> vector<16x128xf32>
    %58 = arith.truncf %57 : vector<16x128xf32> to vector<16x128xbf16>
    %c0_28 = arith.constant 0 : index
    %c0_29 = arith.constant 0 : index
    %59 = vector.load %arg11[%c0_28, %c0_29] : memref<128x128xbf16, #tpu.memory_space<vmem>>, vector<128x128xbf16>
    %cst_30 = arith.constant dense<0.000000e+00> : vector<16x128xf32>
    %60 = tpu.matmul %58, %59, %cst_30 {dimension_numbers = #tpu.dot_dimension_numbers<[1], [0], [0], [1], [0, 0, 1, 1], [], []>} : vector<16x128xbf16>, vector<128x128xbf16>, vector<16x128xf32> -> vector<16x128xf32>
    %c0_31 = arith.constant 0 : index
    %c0_32 = arith.constant 0 : index
    %61 = vector.load %arg12[%c0_31, %c0_32] : memref<1x128xf32, #tpu.memory_space<vmem>>, vector<1x128xf32>
    %62 = vector.broadcast %61 : vector<1x128xf32> to vector<16x128xf32>
    %63 = arith.addf %60, %62 : vector<16x128xf32>
    %cst_33 = arith.constant 0.000000e+00 : f32
    %64 = vector.broadcast %cst_33 : f32 to vector<16x128xf32>
    %65 = arith.cmpf oge, %63, %64 : vector<16x128xf32>
    %cst_34 = arith.constant 3.300000e-01 : f32
    %66 = vector.broadcast %cst_34 : f32 to vector<16x128xf32>
    %67 = arith.mulf %66, %63 : vector<16x128xf32>
    %68 = arith.select %65, %63, %67 : vector<16x128xi1>, vector<16x128xf32>
    %c0_35 = arith.constant 0 : index
    %c0_36 = arith.constant 0 : index
    %69 = vector.load %arg13[%c0_35, %c0_36] : memref<16x128xf32, #tpu.memory_space<vmem>>, vector<16x128xf32>
    tpu.vector_store %arg13[%c0_35, %c0_36], %68 {strides = array<i32>} : memref<16x128xf32, #tpu.memory_space<vmem>>, vector<16x128xf32>,
    return
  }
  func.func @transform_0(%arg0: i32) -> (i32, i32) {
    %c0_i32 = arith.constant 0 : i32
    %c0_i32_0 = arith.constant 0 : i32
    %c0_i32_1 = arith.constant 0 : i32
    return %c0_i32, %c0_i32_0 : i32, i32
  }
  func.func @transform_1(%arg0: i32) -> (i32, i32) {
    %c0_i32 = arith.constant 0 : i32
    %c0_i32_0 = arith.constant 0 : i32
    %c0_i32_1 = arith.constant 0 : i32
    return %c0_i32, %c0_i32_0 : i32, i32
  }
  func.func @transform_2(%arg0: i32) -> (i32, i32) {
    %c0_i32 = arith.constant 0 : i32
    %c0_i32_0 = arith.constant 0 : i32
    %c0_i32_1 = arith.constant 0 : i32
    return %c0_i32, %c0_i32_0 : i32, i32
  }
  func.func @transform_3(%arg0: i32) -> (i32, i32) {
    %c0_i32 = arith.constant 0 : i32
    %c0_i32_0 = arith.constant 0 : i32
    %c0_i32_1 = arith.constant 0 : i32
    return %c0_i32, %c0_i32_0 : i32, i32
  }
  func.func @transform_4(%arg0: i32) -> (i32, i32) {
    %c0_i32 = arith.constant 0 : i32
    %c0_i32_0 = arith.constant 0 : i32
    %c0_i32_1 = arith.constant 0 : i32
    return %c0_i32, %c0_i32_0 : i32, i32
  }
  func.func @transform_5(%arg0: i32) -> (i32, i32) {
    %c0_i32 = arith.constant 0 : i32
    %c0_i32_0 = arith.constant 0 : i32
    %c0_i32_1 = arith.constant 0 : i32
    return %c0_i32, %c0_i32_0 : i32, i32
  }
  func.func @transform_6(%arg0: i32) -> (i32, i32) {
    %c0_i32 = arith.constant 0 : i32
    %c0_i32_0 = arith.constant 0 : i32
    %c0_i32_1 = arith.constant 0 : i32
    return %c0_i32, %c0_i32_0 : i32, i32
  }
  func.func @transform_7(%arg0: i32) -> (i32, i32) {
    %c0_i32 = arith.constant 0 : i32
    %c0_i32_0 = arith.constant 0 : i32
    %c0_i32_1 = arith.constant 0 : i32
    return %c0_i32, %c0_i32_0 : i32, i32
  }
  func.func @transform_8(%arg0: i32) -> (i32, i32) {
    %c0_i32 = arith.constant 0 : i32
    %c0_i32_0 = arith.constant 0 : i32
    %c0_i32_1 = arith.constant 0 : i32
    return %c0_i32, %c0_i32_0 : i32, i32
  }
  func.func @transform_9(%arg0: i32) -> (i32, i32) {
    %c0_i32 = arith.constant 0 : i32
    %c0_i32_0 = arith.constant 0 : i32
    %c0_i32_1 = arith.constant 0 : i32
    return %c0_i32, %c0_i32_0 : i32, i32
  }
  func.func @transform_10(%arg0: i32) -> (i32, i32) {
    %c0_i32 = arith.constant 0 : i32
    %c0_i32_0 = arith.constant 0 : i32
    return %c0_i32, %arg0 : i32, i32
  }
  func.func @transform_11(%arg0: i32) -> (i32, i32) {
    %c0_i32 = arith.constant 0 : i32
    %c0_i32_0 = arith.constant 0 : i32
    return %c0_i32, %arg0 : i32, i32
  }
  func.func @transform_12(%arg0: i32) -> (i32, i32) {
    %c0_i32 = arith.constant 0 : i32
    %c0_i32_0 = arith.constant 0 : i32
    return %c0_i32, %arg0 : i32, i32
  }
}

</mosaic_0001>

<bundles_post_ra>
// kernel: node_alignment_choose.1
= control target key start
LH: loop header
LB: loop body
LE: loop exit
PB: predicated region body
PF: predicated region fallthrough
CT: control target
= control target key end

     0   :  { %17 = vsyncpa [#allocation3], 0  ;;  %s2302_s0 = inlined_call_operand.vmem [shape: bf16[16,16], index: 0, kind: input, shape index: {}]   ;;  %s2303_s1 = inlined_call_operand.vmem [shape: bf16[16,16], index: 1, kind: input, shape index: {}]   ;;  %s2304_s2 = inlined_call_operand.vmem [shape: bf16[8,16], index: 2, kind: input, shape index: {}]   ;;  %s2305_s3 = inlined_call_operand.vmem [shape: f32[8,1], index: 3, kind: input, shape index: {}]   ;;  %s2306_s4 = inlined_call_operand.vmem [shape: bf16[8,16], index: 4, kind: input, shape index: {}]   ;;  %s2307_s5 = inlined_call_operand.vmem [shape: f32[8,1], index: 5, kind: input, shape index: {}]   ;;  %s2308_s6 = inlined_call_operand.vmem [shape: bf16[8,128], index: 6, kind: input, shape index: {}]   ;;  %s2309_s7 = inlined_call_operand.vmem [shape: f32[8,1], index: 7, kind: input, shape index: {}]   ;;  %s2310_s8 = inlined_call_operand.vmem [shape: bf16[8,128], index: 8, kind: input, shape index: {}]   ;;  %s2311_s9 = inlined_call_operand.vmem [shape: f32[8,1], index: 9, kind: input, shape index: {}]   ;;  %s2312_s10 = inlined_call_operand.hbm [shape: bf16[128,256], index: 10, kind: input, shape index: {}]   ;;  %s2313_s11 = inlined_call_operand.vmem [shape: f32[1,256], index: 11, kind: input, shape index: {}]   ;;  %s2314_s12 = inlined_call_operand.vmem [shape: f32[16,256], index: 12, kind: output, shape index: {}]  }
   0x1   :  { %19 = vsyncpa [#allocation3 + $0x1], 0  ;;  %s1989_s21 = smov 0   ;;  %s1991_s22 = smov 0  }
   0x2   :  { %s1993_s23 = smov 0   ;;  %s1995_s24 = smov 0  }
   0x3 LB: > { %s2008_s25 = sadd.s32 4294967295, %s1914_s24   ;;  %s2011_s26 = sadd.s32 1, %s1914_s24   ;;  %s1914_s24 = sphi %s1995_s24, %s2325_s24   ;;  %s1910_s23 = sphi %s1993_s23, %s2324_s23   ;;  %s1906_s22 = sphi %s1991_s22, %s2323_s22   ;;  %s1902_s21 = sphi %s1989_s21, %s2322_s21  }
   0x4   : > { %s239_s27 = ssub.s32 %s1914_s24, %s2011_s26  ;;  %s242_s28 = sadd.s32 1, %s1910_s23 }
   0x5   : > { %p240_p0 = scmp.eq.s32.totalorder %s239_s27, 0  ;;  %p249_p1 = scmp.ne.s32.totalorder %s1910_s23, %s1906_s22 }
   0x6   : > { %p250_p2 = scmp.eq.s32.totalorder %s1914_s24, 0  ;;  %p255_p3 = scmp.ne.s32.totalorder %s1906_s22, %s1902_s21 }
   0x7   : > { %s2021_s29 = scalar_select %p240_p0, %s1910_s23, %s242_s28  }
   0x8   : > { %p2023_p4 = por %p250_p2, %p249_p1  ;;  %p256_p5 = scmp.eq.s32.totalorder %s2008_s25, 0 }
   0x9   : > { %2315 = sst [smem:[#allocation6_spill]] %s2021_s29  ;;  %p305_p6 = scmp.eq.s32.totalorder %s2008_s25, 1 }
   0xa   : > { %p2029_p7 = por %p256_p5, %p255_p3  ;;  %p1798_p8 = scmp.lt.s32.totalorder %s1914_s24, 2 }
   0xb   : > { %p2034_p9 = por %p305_p6, %p249_p1  ;;  %s361_s15 = sand.u32 1, %s1910_s23  }
   0xc   : > { %s1667_s16 = sshll.u32 %s361_s15, 6  ;;  %s1668_s17 = sshll.u32 %s1914_s24, 6 }
   0xd   : > { %s2318_s14 = scalar_select %p2034_p9, 1, 0 }
   0xe   : > { %s2043_s20 = scalar_lea.hbm %s2312_s10, %s1668_s17  ;;  %s365_s21 = scalar_lea.vmem [#allocation2], %s1667_s16 }
   0xf   : > { %s371_s27 = sshll.u32 %s365_s21, 4  ;;  %p2049_p10 = pnand %p1798_p8, %p2023_p4  ;;  %s2045_s27 = int_to_ptr.vmem [resolvable:$true] %s371_s27 }
  0x10   : > { %s2053_s29 = scalar_lea.sflag [#allocation3], %s361_s15  ;;  %s1850_s18 = scalar_lea.hbm %s2043_s20, 1024 }
  0x11   : > { %p1851_p11 = scmp.ne.s32.totalorder %s2043_s20, %s1850_s18  ;;  %p1852_p12 = pneg %p2049_p10 }
  0x12   : > { %s1855_s30 = scalar_lea.hbm %s2312_s10, 2048  ;;  %p1856_p1 = scmp.lt.u32.totalorder %s2043_s20, %s2312_s10 }
  0x13   : > { %p1853_p13 = pnand %p1852_p12, %p1851_p11  ;;  %p1857_p2 = scmp.lt.u32.totalorder %s1855_s30, %s1850_s18 }
  0x14   : > { %p1859_p4 = scmp.lt.u32.totalorder %s1850_s18, %s2043_s20 }
  0x15   : > { %p1854_p0 = pneg %p1853_p13  ;;  %p1858_p3 = por %p1857_p2, %p1856_p1 }
  0x17   : > { %p1860_p5 = por %p1859_p4, %p1858_p3 }
  0x19   : > { %p1861_p6 = pnand %p1860_p5, %p1854_p0 }
  0x1b   : > { %1864 = shalt.err (!%p1861_p6)
}
  0x1c   : > { %s1865_s15 = scalar_lea.vmem %s2045_s27, 1024  ;;  %s1916_s16 = smov [#allocation2]  }
  0x1d   : > { %p1866_p8 = scmp.ne.s32.totalorder %s2045_s27, %s1865_s15  ;;  %s1870_s17 = sshll.u32 %s1916_s16, 4  ;;  %s1871_s17 = int_to_ptr.vmem [resolvable:$false] %s1870_s17 }
  0x1e   : > { %s1872_s19 = scalar_lea.vmem %s1871_s17, 2048  ;;  %p1873_p9 = scmp.lt.s32.totalorder %s2045_s27, %s1871_s17 }
  0x1f   : > { %p1868_p11 = pnand %p1866_p8, %p1852_p12  ;;  %p1874_p1 = scmp.lt.s32.totalorder %s1872_s19, %s1865_s15 }
  0x21   : > { %p1869_p13 = pneg %p1868_p11  ;;  %p1875_p2 = por %p1874_p1, %p1873_p9 }
  0x23   : > { %p1876_p3 = pnand %p1875_p2, %p1869_p13 }
  0x25   : > { %1879 = shalt.err (!%p1876_p3)
}
  0x26   : > { %s1917_s18 = smov 128   ;;  %s1918_s30 = smov 64  }
  0x27   : > { %s1919_s21 = smov 4   ;;  %p1669_p12 = scmp.ge.s32.totalorder %s1914_s24, 1 }
  0x28   : > { %1797 = dma.hbm_to_vmem [thread:$0]  (!%p2049_p10), %s2043_s20, 1024, %s2045_s27, %s2053_s29, %s1917_s18, %s1918_s30, %s1919_s21  }
  0x29   : > { %p385_p0 = scmp.lt.s32.totalorder %s1914_s24, 3 }
  0x2b   : > { %p386_p4 = pnand %p1669_p12, %p385_p0 }
  0x2c   : > { %s2084_s15 = sand.u32 (!%p386_p4), 1, %s1906_s22  }
  0x2d   : > { %389 = sbr.rel (%p386_p4) target bundleno = 1140 (0x474), region = 68  ;;  %s1670_s16 = sshll.u32 (!%p386_p4), %s2084_s15, 6 }
  0x2e   : > { %s392_s17 = scalar_lea.sflag (!%p386_p4), [#allocation3], %s2084_s15  ;;  %s2088_s19 = scalar_lea.vmem (!%p386_p4), [#allocation2], %s1670_s16 }
  0x34   : > { %1897 = dma.done.wait (%p2029_p7), %s392_s17, 1024  }
  0x35   : > { %1899 = vsyncadd (%p2029_p7), %s392_s17, 4294966272  ;;  %v1920_v0 = vmov 0.0   ;;  %vm1921_vm0 = vmmov 0   ;;  %v1922_v1 = vmov 0   ;;  %v1840_v2 = vld [vmem:[%s2302_s0] sm:$0xff]   ;;  %vm457_vm1 = vcmask 130048  }
  0x36   : > { %1720 = vmatprep.subr.bf16.mxu1 %v1920_v0  ;;  %1722 = vmatprep.mubr.msk.bf16.mxu1 %vm1921_vm0, %v1920_v0  ;;  %v442_v3 = vld [vmem:[%s2304_s2] sm:$0xf]  ;;  %v559_v10 = vlaneseq  ;;  %v1923_v48 = vmov 1966171168   ;;  %p438_p7 = scmp.lt.s32.totalorder %s2008_s25, 1  ;;  %s1671_s29 = sshll.u32 %s2084_s15, 4 }
  0x37   : > { %1838 = vset.pattern.permute.xlu0 %v1922_v1  ;;  %1732 = vmatprep.subr.bf16.mxu0 %v1920_v0  ;;  %v1841_v4 = vld [vmem:[%s2303_s1] sm:$0xff]   ;;  %v650_v49 = vunpack.c.l.s4 %v1923_v48  ;;  %s437_s13 = scalar_lea.vmem [#allocation4], %s1671_s29  ;;  %p2320_p9 = scmp.ne.s32.totalorder %s2318_s14, 0 }
  0x38   : > { %1748 = vmatprep.mubr.msk.bf16.mxu0 %vm1921_vm0, %v1920_v0  ;;  %1839 = vset.pattern.permute.xlu1 %v1922_v1  ;;  %v504_v5 = vld [vmem:[%s2307_s5] sm:$0xff]  ;;  %v2124_v13 = vshrl.u32 %v559_v10, 7  ;;  %s1686_s15 = sshll.u32 (%p2320_p9), %s2008_s25, 3 }
  0x39   : > { %1721 = vmatpush3.bf16.msra.mxu1 %v1840_v2  ;;  %507 = vperm.xlu0 %1838, %v504_v5   ;;  %v445_v6 = vld [vmem:[%s2305_s3] sm:$0xff]  ;;  %v651_v50 = vunpack.c.0.s8 %v650_v49  ;;  %s1556_s28 = scalar_lea.vmem (%p2320_p9), %s2314_s12, %s1686_s15 }
  0x3a   : > { %1726 = vmatprep.subr.bf16.mxu1 %v1920_v0  ;;  %v501_v7 = vld [vmem:[%s2306_s4] sm:$0xf]  ;;  %v2129_v18 = vsub.s32 0, %v2124_v13  ;;  %v2132_v19 = vsub.s32 1, %v2124_v13  ;;  %v2139_v24 = vsub.s32 2, %v2124_v13  ;;  %v2144_v26 = vsub.s32 3, %v2124_v13 }
  0x3b   : > { %v2149_v28 = vsub.s32 4, %v2124_v13  ;;  %v2154_v30 = vsub.s32 5, %v2124_v13  ;;  %v2159_v32 = vsub.s32 6, %v2124_v13  ;;  %v2164_v35 = vsub.s32 7, %v2124_v13  ;;  %v1052_v46 = vld [vmem:[%s2309_s7] sm:$0xff] }
  0x3c   : > { %1723 = vmatmul.mubr.msk.bf16.vlgmr.msra.gmra.mrb[0].mxu1 %vm457_vm1, %v442_v3  ;;  %v1107_v47 = vld [vmem:[%s2311_s9] sm:$0xff]  ;;  %v2183_v51 = vsub.s32 %v651_v50, %v2124_v13 }
  0x3d   : > { %1727 = vmatpush3.bf16.msra.mxu1 %v1841_v4  ;;  %1728 = vmatprep.mubr.msk.bf16.mxu1 %vm1921_vm0, %v1920_v0 }
  0x3e   : > { %448 = vperm.xlu0 %1838, %v445_v6   ;;  %1752 = vmatprep.subr.bf16.mxu1 %v1920_v0 }
  0x44   : > { %1729 = vmatmul.mubr.msk.bf16.vlgmr.msra.gmra.mrb[4].mxu1 %vm457_vm1, %v501_v7 }
  0x45   : > { %1768 = vmatprep.mubr.msk.bf16.mxu1 %vm1921_vm0, %v1920_v0 }
  0xb8   : > { %v508_v14 = vpop.permute.xlu0 %507 }
  0xbd   : > { %v449_v34 = vpop.permute.xlu0 %448 }
 0x10f   : > { %v495_v8 = vpop.f32.mrb[0].mxu1 }
 0x110   : > { %v1724_v9 = vpop.f32.mrb[1].mxu1  ;;  %v496_v36 = vadd.f32 %v495_v8, %v449_v34 }
 0x111   : > { %v498_v11 = vpop.f32.mrb[2].mxu1 }
 0x112   : > { %v1725_v12 = vpop.f32.mrb[3].mxu1  ;;  %v804_v38 = vrot.slane %v496_v36, %v2129_v18  ;;  %v815_v39 = vrot.slane %v496_v36, %v2132_v19  ;;  %v826_v40 = vrot.slane %v496_v36, %v2139_v24  ;;  %v837_v41 = vrot.slane %v496_v36, %v2144_v26 }
 0x113   : > { %v848_v42 = vrot.slane %v496_v36, %v2149_v28  ;;  %v859_v43 = vrot.slane %v496_v36, %v2154_v30  ;;  %v870_v44 = vrot.slane %v496_v36, %v2159_v32  ;;  %v881_v45 = vrot.slane %v496_v36, %v2164_v35 }
 0x114   : > { %v655_v52 = vrot.slane %v496_v36, %v2183_v51  ;;  %v648_v61 = vcombine.high %v496_v36, %v496_v36 }
 0x116   : > { %v663_v53 = vcombine.high %v655_v52, %v655_v52  ;;  %v671_v54 = vrot.slane %v655_v52, %v2183_v51  ;;  %v662_v5 = vrot.slane %v648_v61, %v2183_v51 }
 0x117   : > { %v553_v15 = vpop.f32.mrb[4].mxu1 }
 0x118   : > { %v2126_v16 = vadd.f32 %v553_v15, %v508_v14  ;;  %v1730_v17 = vpop.f32.mrb[5].mxu1  ;;  %v685_v55 = vrot.slane %v663_v53, %v2183_v51  ;;  %v700_v56 = vrot.slane %v671_v54, %v2129_v18  ;;  %v693_v62 = vcombine.high %v671_v54, %v671_v54 }
 0x119   : > { %v556_v20 = vpop.f32.mrb[6].mxu1  ;;  %v678_v17 = vrot.slane %v662_v5, %v2183_v51 }
 0x11a   : > { %v1731_v21 = vpop.f32.mrb[7].mxu1  ;;  %v573_v22 = vrot.slane %v2126_v16, %v2132_v19  ;;  %v562_v23 = vrot.slane %v2126_v16, %v2129_v18  ;;  %v584_v25 = vrot.slane %v2126_v16, %v2139_v24  ;;  %v595_v27 = vrot.slane %v2126_v16, %v2144_v26 }
 0x11b   : > { %v606_v29 = vrot.slane %v2126_v16, %v2149_v28  ;;  %v617_v31 = vrot.slane %v2126_v16, %v2154_v30  ;;  %v628_v33 = vrot.slane %v2126_v16, %v2159_v32  ;;  %v639_v37 = vrot.slane %v2126_v16, %v2164_v35 }
 0x11c   : > { %575 = vbcast.lane.b32.xlu0 %v573_v22, 256  ;;  %564 = vbcast.lane.b32.xlu1 %v562_v23, 256  ;;  %v704_v60 = vrot.slane %v685_v55, %v2129_v18  ;;  %v708_v6 = vrot.slane %v693_v62, %v2129_v18  ;;  %v695_v8 = vcombine.high %v685_v55, %v685_v55 }
 0x11d   : > { %v664_v21 = vcombine.high %v662_v5, %v662_v5  ;;  %v694_v52 = vcombine.high %v678_v17, %v678_v17  ;;  %v897_v61 = vrot.slane %v2126_v16, %v2183_v51 }
 0x11f   : > { %v724_v62 = vrot.slane %v694_v52, %v2129_v18 }
 0x120   : > { %586 = vbcast.lane.b32.xlu0 %v584_v25, 256  ;;  %568 = vbcast.lane.b32.xlu1 %v562_v23, 264 }
 0x124   : > { %597 = vbcast.lane.b32.xlu0 %v595_v27, 256  ;;  %579 = vbcast.lane.b32.xlu1 %v573_v22, 264  ;;  %v712_v22 = vrot.slane %v695_v8, %v2129_v18 }
 0x128   : > { %608 = vbcast.lane.b32.xlu0 %v606_v29, 256  ;;  %590 = vbcast.lane.b32.xlu1 %v584_v25, 264 }
 0x12c   : > { %619 = vbcast.lane.b32.xlu0 %v617_v31, 256  ;;  %601 = vbcast.lane.b32.xlu1 %v595_v27, 264 }
 0x130   : > { %630 = vbcast.lane.b32.xlu0 %v628_v33, 256  ;;  %612 = vbcast.lane.b32.xlu1 %v606_v29, 264 }
 0x134   : > { %641 = vbcast.lane.b32.xlu0 %v639_v37, 256  ;;  %623 = vbcast.lane.b32.xlu1 %v617_v31, 264 }
 0x138   : > { %806 = vbcast.lane.b32.xlu0 %v804_v38, 256  ;;  %634 = vbcast.lane.b32.xlu1 %v628_v33, 264 }
 0x13c   : > { %817 = vbcast.lane.b32.xlu0 %v815_v39, 256  ;;  %645 = vbcast.lane.b32.xlu1 %v639_v37, 264  ;;  %v716_v37 = vrot.slane %v678_v17, %v2129_v18 }
 0x140   : > { %828 = vbcast.lane.b32.xlu0 %v826_v40, 256  ;;  %810 = vbcast.lane.b32.xlu1 %v804_v38, 264  ;;  %v692_v38 = vrot.slane %v664_v21, %v2183_v51 }
 0x142   : > { %v720_v48 = vrot.slane %v692_v38, %v2129_v18 }
 0x144   : > { %839 = vbcast.lane.b32.xlu0 %v837_v41, 256  ;;  %821 = vbcast.lane.b32.xlu1 %v815_v39, 264 }
 0x148   : > { %850 = vbcast.lane.b32.xlu0 %v848_v42, 256  ;;  %832 = vbcast.lane.b32.xlu1 %v826_v40, 264 }
 0x14c   : > { %861 = vbcast.lane.b32.xlu0 %v859_v43, 256  ;;  %843 = vbcast.lane.b32.xlu1 %v837_v41, 264 }
 0x150   : > { %872 = vbcast.lane.b32.xlu0 %v870_v44, 256  ;;  %854 = vbcast.lane.b32.xlu1 %v848_v42, 264 }
 0x154   : > { %883 = vbcast.lane.b32.xlu0 %v881_v45, 256  ;;  %865 = vbcast.lane.b32.xlu1 %v859_v43, 264 }
 0x158   : > { %1055 = vperm.xlu0 %1838, %v1052_v46   ;;  %876 = vbcast.lane.b32.xlu1 %v870_v44, 264 }
 0x15c   : > { %887 = vbcast.lane.b32.xlu1 %v881_v45, 264 }
 0x160   : > { %1110 = vperm.xlu1 %1839, %v1107_v47  }
 0x18e   : > { %v576_v57 = vpop.permute.xlu0 %575  ;;  %v565_v58 = vpop.permute.xlu1 %564 }
 0x18f   : > { %v737_v59 = vadd.f32 %v700_v56, %v565_v58  ;;  %v739_v63 = vadd.f32 %v704_v60, %v576_v57 }
 0x191   : > { %v769_v3 = vmul.f32 0.33, %v737_v59  ;;  %vm753_vm2 = vcmp.ge.f32.partialorder %v737_v59, 0.0  ;;  %vm755_vm4 = vcmp.ge.f32.partialorder %v739_v63, 0.0  ;;  %v771_v9 = vmul.f32 0.33, %v739_v63 }
 0x192   : > { %v587_v1 = vpop.permute.xlu0 %586  ;;  %v569_v2 = vpop.permute.xlu1 %568 }
 0x193   : > { %v738_v4 = vadd.f32 %v700_v56, %v569_v2  ;;  %v741_v12 = vadd.f32 %v708_v6, %v587_v1  ;;  %v785_v14 = vsel %vm753_vm2, %v737_v59, %v769_v3  ;;  %v787_v29 = vsel %vm755_vm4, %v739_v63, %v771_v9 }
 0x194   : > { %v696_v1 = vcombine.high %v692_v38, %v692_v38  ;;  %v913_v9 = vrot.slane %v897_v61, %v2183_v51 }
 0x195   : > { %v770_v7 = vmul.f32 0.33, %v738_v4  ;;  %vm754_vm3 = vcmp.ge.f32.partialorder %v738_v4, 0.0  ;;  %v773_v31 = vmul.f32 0.33, %v741_v12  ;;  %vm757_vm6 = vcmp.ge.f32.partialorder %v741_v12, 0.0 }
 0x196   : > { %v598_v10 = vpop.permute.xlu0 %597  ;;  %v580_v11 = vpop.permute.xlu1 %579 }
 0x197   : > { %v740_v13 = vadd.f32 %v704_v60, %v580_v11  ;;  %v786_v15 = vsel %vm754_vm3, %v738_v4, %v770_v7  ;;  %v743_v33 = vadd.f32 %v712_v22, %v598_v10  ;;  %v789_v46 = vsel %vm757_vm6, %v741_v12, %v773_v31 }
 0x198   : > { %v1044_v20 = vpack.c.bf16 %v786_v15, %v785_v14  ;;  %v905_v11 = vcombine.high %v897_v61, %v897_v61  ;;  %v728_v12 = vrot.slane %v696_v1, %v2129_v18 }
 0x199   : > { %vm756_vm5 = vcmp.ge.f32.partialorder %v740_v13, 0.0  ;;  %v772_v23 = vmul.f32 0.33, %v740_v13  ;;  %v775_v44 = vmul.f32 0.33, %v743_v33  ;;  %vm759_vm8 = vcmp.ge.f32.partialorder %v743_v33, 0.0 }
 0x19a   : > { %v609_v25 = vpop.permute.xlu0 %608  ;;  %1733 = vmatpush3.bf16.msra.mxu0 %v1044_v20  ;;  %v591_v27 = vpop.permute.xlu1 %590 }
 0x19b   : > { %v742_v34 = vadd.f32 %v708_v6, %v591_v27  ;;  %1734 = vmatprep.subr.bf16.mxu0 %v1920_v0  ;;  %v788_v36 = vsel %vm756_vm5, %v740_v13, %v772_v23  ;;  %v745_v41 = vadd.f32 %v716_v37, %v609_v25  ;;  %v791_v58 = vsel %vm759_vm8, %v743_v33, %v775_v44 }
 0x19c   : > { %v1045_v39 = vpack.c.bf16 %v788_v36, %v787_v29  ;;  %v942_v25 = vrot.slane %v913_v9, %v2129_v18  ;;  %v927_v27 = vrot.slane %v905_v11, %v2183_v51 }
 0x19d   : > { %vm758_vm7 = vcmp.ge.f32.partialorder %v742_v34, 0.0  ;;  %v774_v40 = vmul.f32 0.33, %v742_v34  ;;  %v777_v53 = vmul.f32 0.33, %v745_v41  ;;  %vm761_vm10 = vcmp.ge.f32.partialorder %v745_v41, 0.0 }
 0x19e   : > { %v620_v42 = vpop.permute.xlu0 %619  ;;  %1735 = vmatpush3.bf16.msra.mxu0 %v1045_v39  ;;  %v602_v43 = vpop.permute.xlu1 %601 }
 0x19f   : > { %v744_v45 = vadd.f32 %v712_v22, %v602_v43  ;;  %1736 = vmatprep.subr.bf16.mxu0 %v1920_v0  ;;  %v790_v47 = vsel %vm758_vm7, %v742_v34, %v774_v40  ;;  %v747_v54 = vadd.f32 %v720_v48, %v620_v42  ;;  %v793_v5 = vsel %vm761_vm10, %v745_v41, %v777_v53 }
 0x1a0   : > { %v1046_v49 = vpack.c.bf16 %v790_v47, %v789_v46  ;;  %v946_v41 = vrot.slane %v927_v27, %v2129_v18  ;;  %v890_v43 = vcombine.high %v2126_v16, %v2126_v16 }
 0x1a1   : > { %vm760_vm9 = vcmp.ge.f32.partialorder %v744_v45, 0.0  ;;  %v776_v50 = vmul.f32 0.33, %v744_v45  ;;  %v779_v2 = vmul.f32 0.33, %v747_v54  ;;  %vm763_vm12 = vcmp.ge.f32.partialorder %v747_v54, 0.0 }
 0x1a2   : > { %v631_v55 = vpop.permute.xlu0 %630  ;;  %1737 = vmatpush3.bf16.msra.mxu0 %v1046_v49  ;;  %v613_v56 = vpop.permute.xlu1 %612 }
 0x1a3   : > { %v746_v57 = vadd.f32 %v716_v37, %v613_v56  ;;  %1738 = vmatprep.subr.bf16.mxu0 %v1920_v0  ;;  %v792_v59 = vsel %vm760_vm9, %v744_v45, %v776_v50  ;;  %v749_v6 = vadd.f32 %v724_v62, %v631_v55  ;;  %v795_v17 = vsel %vm763_vm12, %v747_v54, %v779_v2 }
 0x1a4   : > { %v1047_v60 = vpack.c.bf16 %v792_v59, %v791_v58  ;;  %v935_v45 = vcombine.high %v913_v9, %v913_v9  ;;  %v904_v55 = vrot.slane %v890_v43, %v2183_v51 }
 0x1a5   : > { %vm762_vm11 = vcmp.ge.f32.partialorder %v746_v57, 0.0  ;;  %v778_v63 = vmul.f32 0.33, %v746_v57  ;;  %v781_v20 = vmul.f32 0.33, %v749_v6  ;;  %vm765_vm14 = vcmp.ge.f32.partialorder %v749_v6, 0.0 }
 0x1a6   : > { %v642_v3 = vpop.permute.xlu0 %641  ;;  %1739 = vmatpush3.bf16.msra.mxu0 %v1047_v60  ;;  %v624_v4 = vpop.permute.xlu1 %623  ;;  %v950_v56 = vrot.slane %v935_v45, %v2129_v18 }
 0x1a7   : > { %v748_v7 = vadd.f32 %v720_v48, %v624_v4  ;;  %1740 = vmatprep.subr.bf16.mxu0 %v1920_v0  ;;  %v794_v8 = vsel %vm762_vm11, %v746_v57, %v778_v63  ;;  %v751_v21 = vadd.f32 %v728_v12, %v642_v3  ;;  %v797_v39 = vsel %vm765_vm14, %v749_v6, %v781_v20 }
 0x1a8   : > { %v1048_v10 = vpack.c.bf16 %v794_v8, %v793_v5  ;;  %v937_v57 = vcombine.high %v927_v27, %v927_v27  ;;  %v920_v4 = vrot.slane %v904_v55, %v2183_v51  ;;  %v906_v5 = vcombine.high %v904_v55, %v904_v55 }
 0x1a9   : > { %vm764_vm13 = vcmp.ge.f32.partialorder %v748_v7, 0.0  ;;  %v780_v13 = vmul.f32 0.33, %v748_v7  ;;  %v783_v37 = vmul.f32 0.33, %v751_v21  ;;  %vm767_vm1 = vcmp.ge.f32.partialorder %v751_v21, 0.0 }
 0x1aa   : > { %v807_v14 = vpop.permute.xlu0 %806  ;;  %1741 = vmatpush3.bf16.msra.mxu0 %v1048_v10  ;;  %v635_v15 = vpop.permute.xlu1 %634  ;;  %v954_v6 = vrot.slane %v937_v57, %v2129_v18  ;;  %v934_v20 = vrot.slane %v906_v5, %v2183_v51 }
 0x1ab   : > { %v750_v22 = vadd.f32 %v724_v62, %v635_v15  ;;  %1742 = vmatprep.subr.bf16.mxu0 %v1920_v0  ;;  %v796_v23 = vsel %vm764_vm13, %v748_v7, %v780_v13  ;;  %v979_v33 = vadd.f32 %v942_v25, %v807_v14  ;;  %v799_v52 = vsel %vm767_vm1, %v751_v21, %v783_v37  ;;  %v1043_v62 = vld [vmem:[%s2308_s6] sm:$0xf] }
 0x1ac   : > { %v1049_v29 = vpack.c.bf16 %v796_v23, %v795_v17  ;;  %v958_v17 = vrot.slane %v920_v4, %v2129_v18 }
 0x1ad   : > { %vm766_vm15 = vcmp.ge.f32.partialorder %v750_v22, 0.0  ;;  %v782_v31 = vmul.f32 0.33, %v750_v22  ;;  %v1011_v46 = vmul.f32 0.33, %v979_v33  ;;  %vm995_vm3 = vcmp.ge.f32.partialorder %v979_v33, 0.0 }
 0x1ae   : > { %v818_v34 = vpop.permute.xlu0 %817  ;;  %1743 = vmatpush3.bf16.msra.mxu0 %v1049_v29  ;;  %v646_v36 = vpop.permute.xlu1 %645 }
 0x1af   : > { %v752_v38 = vadd.f32 %v728_v12, %v646_v36  ;;  %1744 = vmatprep.subr.bf16.mxu0 %v1920_v0  ;;  %v798_v40 = vsel %vm766_vm15, %v750_v22, %v782_v31  ;;  %v981_v47 = vadd.f32 %v946_v41, %v818_v34  ;;  %v1027_v58 = vsel %vm995_vm3, %v979_v33, %v1011_v46 }
 0x1b0   : > { %v1050_v42 = vpack.c.bf16 %v798_v40, %v797_v39  ;;  %v962_v36 = vrot.slane %v934_v20, %v2129_v18 }
 0x1b1   : > { %vm768_vm2 = vcmp.ge.f32.partialorder %v752_v38, 0.0  ;;  %v784_v44 = vmul.f32 0.33, %v752_v38  ;;  %v1013_v59 = vmul.f32 0.33, %v981_v47  ;;  %vm997_vm5 = vcmp.ge.f32.partialorder %v981_v47, 0.0 }
 0x1b2   : > { %v829_v48 = vpop.permute.xlu0 %828  ;;  %1745 = vmatpush3.bf16.msra.mxu0 %v1050_v42  ;;  %v811_v49 = vpop.permute.xlu1 %810 }
 0x1b3   : > { %v980_v50 = vadd.f32 %v942_v25, %v811_v49  ;;  %1746 = vmatprep.subr.bf16.mxu0 %v1920_v0  ;;  %v800_v53 = vsel %vm768_vm2, %v752_v38, %v784_v44  ;;  %v983_v63 = vadd.f32 %v950_v56, %v829_v48  ;;  %v1029_v8 = vsel %vm997_vm5, %v981_v47, %v1013_v59 }
 0x1b4   : > { %v1051_v54 = vpack.c.bf16 %v800_v53, %v799_v52  ;;  %v936_v38 = vcombine.high %v920_v4, %v920_v4  ;;  %v938_v49 = vcombine.high %v934_v20, %v934_v20 }
 0x1b5   : > { %vm996_vm4 = vcmp.ge.f32.partialorder %v980_v50, 0.0  ;;  %v1012_v16 = vmul.f32 0.33, %v980_v50  ;;  %v1015_v11 = vmul.f32 0.33, %v983_v63  ;;  %vm999_vm7 = vcmp.ge.f32.partialorder %v983_v63, 0.0 }
 0x1b6   : > { %v840_v60 = vpop.permute.xlu0 %839  ;;  %1747 = vmatpush3.bf16.msra.mxu0 %v1051_v54  ;;  %v822_v61 = vpop.permute.xlu1 %821  ;;  %v966_v47 = vrot.slane %v936_v38, %v2129_v18 }
 0x1b7   : > { %v1028_v1 = vsel %vm996_vm4, %v980_v50, %v1012_v16  ;;  %v982_v2 = vadd.f32 %v946_v41, %v822_v61  ;;  %1772 = vmatprep.subr.bf16.mxu0 %v1920_v0  ;;  %v985_v12 = vadd.f32 %v954_v6, %v840_v60  ;;  %v1031_v27 = vsel %vm999_vm7, %v983_v63, %v1015_v11 }
 0x1b8   : > { %v1099_v3 = vpack.c.bf16 %v1028_v1, %v1027_v58  ;;  %v970_v58 = vrot.slane %v938_v49, %v2129_v18 }
 0x1b9   : > { %vm998_vm6 = vcmp.ge.f32.partialorder %v982_v2, 0.0  ;;  %v1014_v7 = vmul.f32 0.33, %v982_v2  ;;  %1749 = vmatmul.mubr.bf16.vlgmr.msra.gmra.mrb[0].mxu0 %v1043_v62  ;;  %v1017_v29 = vmul.f32 0.33, %v985_v12 }
 0x1ba   : > { %v851_v9 = vpop.permute.xlu0 %850  ;;  %1753 = vmatpush3.bf16.msra.mxu1 %v1099_v3  ;;  %v833_v10 = vpop.permute.xlu1 %832  ;;  %1788 = vmatprep.mubr.msk.bf16.mxu0 %vm1921_vm0, %v1920_v0  ;;  %vm1001_vm0 = vcmp.ge.f32.partialorder %v985_v12, 0.0 }
 0x1bb   : > { %v1030_v13 = vsel %vm998_vm6, %v982_v2, %v1014_v7  ;;  %v984_v14 = vadd.f32 %v950_v56, %v833_v10  ;;  %1754 = vmatprep.subr.bf16.mxu1 %v1920_v0  ;;  %v987_v22 = vadd.f32 %v958_v17, %v851_v9  ;;  %v1033_v43 = vsel %vm1001_vm0, %v985_v12, %v1017_v29 }
 0x1bc   : > { %v1100_v15 = vpack.c.bf16 %v1030_v13, %v1029_v8 }
 0x1bd   : > { %vm1000_vm8 = vcmp.ge.f32.partialorder %v984_v14, 0.0  ;;  %v1016_v21 = vmul.f32 0.33, %v984_v14  ;;  %v1019_v39 = vmul.f32 0.33, %v987_v22  ;;  %vm1003_vm10 = vcmp.ge.f32.partialorder %v987_v22, 0.0 }
 0x1be   : > { %v862_v23 = vpop.permute.xlu0 %861  ;;  %1755 = vmatpush3.bf16.msra.mxu1 %v1100_v15  ;;  %v844_v25 = vpop.permute.xlu1 %843  ;;  %v1098_v15 = vld [vmem:[%s2310_s8] sm:$0xf] }
 0x1bf   : > { %v1032_v31 = vsel %vm1000_vm8, %v984_v14, %v1016_v21  ;;  %v986_v33 = vadd.f32 %v954_v6, %v844_v25  ;;  %1756 = vmatprep.subr.bf16.mxu1 %v1920_v0  ;;  %v989_v40 = vadd.f32 %v962_v36, %v862_v23  ;;  %v1035_v50 = vsel %vm1003_vm10, %v987_v22, %v1019_v39  ;;  %v1842_v39 = vld [vmem:[%s2088_s19] sm:$0xff]  }
 0x1c0   : > { %v1101_v34 = vpack.c.bf16 %v1032_v31, %v1031_v27  ;;  %1773 = vmatpush3.bf16.msra.mxu0 %v1842_v39 }
 0x1c1   : > { %vm1002_vm9 = vcmp.ge.f32.partialorder %v986_v33, 0.0  ;;  %v1018_v37 = vmul.f32 0.33, %v986_v33  ;;  %v1021_v52 = vmul.f32 0.33, %v989_v40  ;;  %vm1005_vm12 = vcmp.ge.f32.partialorder %v989_v40, 0.0  ;;  %1774 = vmatprep.subr.bf16.mxu0 %v1920_v0 }
 0x1c2   : > { %v873_v41 = vpop.permute.xlu0 %872  ;;  %1757 = vmatpush3.bf16.msra.mxu1 %v1101_v34  ;;  %v855_v42 = vpop.permute.xlu1 %854 }
 0x1c3   : > { %v1034_v44 = vsel %vm1002_vm9, %v986_v33, %v1018_v37  ;;  %v988_v45 = vadd.f32 %v958_v17, %v855_v42  ;;  %1758 = vmatprep.subr.bf16.mxu1 %v1920_v0  ;;  %v991_v54 = vadd.f32 %v966_v47, %v873_v41  ;;  %v1037_v60 = vsel %vm1005_vm12, %v989_v40, %v1021_v52  ;;  %v1846_v40 = vld [vmem:[%s2088_s19 + $0x20] sm:$0xff]   ;;  %v1847_v41 = vld [vmem:[%s2088_s19 + $0x28] sm:$0xff]   ;;  %v1848_v42 = vld [vmem:[%s2088_s19 + $0x30] sm:$0xff]  }
 0x1c4   : > { %v1102_v46 = vpack.c.bf16 %v1034_v44, %v1033_v43 }
 0x1c5   : > { %vm1004_vm11 = vcmp.ge.f32.partialorder %v988_v45, 0.0  ;;  %v1020_v48 = vmul.f32 0.33, %v988_v45  ;;  %v1023_v62 = vmul.f32 0.33, %v991_v54  ;;  %vm1007_vm14 = vcmp.ge.f32.partialorder %v991_v54, 0.0 }
 0x1c6   : > { %1759 = vmatpush3.bf16.msra.mxu1 %v1102_v46  ;;  %v866_v53 = vpop.permute.xlu1 %865  ;;  %v884_v57 = vpop.permute.xlu0 %883 }
 0x1c7   : > { %v1036_v55 = vsel %vm1004_vm11, %v988_v45, %v1020_v48  ;;  %v990_v56 = vadd.f32 %v962_v36, %v866_v53  ;;  %1760 = vmatprep.subr.bf16.mxu1 %v1920_v0  ;;  %v993_v63 = vadd.f32 %v970_v58, %v884_v57  ;;  %v1039_v6 = vsel %vm1007_vm14, %v991_v54, %v1023_v62 }
 0x1c8   : > { %v1103_v16 = vpack.c.bf16 %v1036_v55, %v1035_v50 }
 0x1c9   : > { %vm1006_vm13 = vcmp.ge.f32.partialorder %v990_v56, 0.0  ;;  %v1022_v59 = vmul.f32 0.33, %v990_v56  ;;  %v1025_v7 = vmul.f32 0.33, %v993_v63  ;;  %vm1009_vm1 = vcmp.ge.f32.partialorder %v993_v63, 0.0 }
 0x1ca   : > { %1761 = vmatpush3.bf16.msra.mxu1 %v1103_v16  ;;  %v877_v61 = vpop.permute.xlu1 %876 }
 0x1cb   : > { %v1038_v1 = vsel %vm1006_vm13, %v990_v56, %v1022_v59  ;;  %v992_v2 = vadd.f32 %v966_v47, %v877_v61  ;;  %1762 = vmatprep.subr.bf16.mxu1 %v1920_v0  ;;  %v1041_v12 = vsel %vm1009_vm1, %v993_v63, %v1025_v7 }
 0x1cc   : > { %v1104_v3 = vpack.c.bf16 %v1038_v1, %v1037_v60  ;;  %v1849_v60 = vld [vmem:[%s2088_s19 + $0x38] sm:$0xff]  }
 0x1cd   : > { %vm1008_vm15 = vcmp.ge.f32.partialorder %v992_v2, 0.0  ;;  %v1024_v4 = vmul.f32 0.33, %v992_v2 }
 0x1ce   : > { %1763 = vmatpush3.bf16.msra.mxu1 %v1104_v3  ;;  %v888_v5 = vpop.permute.xlu1 %887 }
 0x1cf   : > { %v1040_v8 = vsel %vm1008_vm15, %v992_v2, %v1024_v4  ;;  %v994_v9 = vadd.f32 %v970_v58, %v888_v5  ;;  %1764 = vmatprep.subr.bf16.mxu1 %v1920_v0 }
 0x1d0   : > { %v1105_v10 = vpack.c.bf16 %v1040_v8, %v1039_v6 }
 0x1d1   : > { %vm1010_vm2 = vcmp.ge.f32.partialorder %v994_v9, 0.0  ;;  %v1026_v11 = vmul.f32 0.33, %v994_v9 }
 0x1d2   : > { %1765 = vmatpush3.bf16.msra.mxu1 %v1105_v10 }
 0x1d3   : > { %v1042_v13 = vsel %vm1010_vm2, %v994_v9, %v1026_v11  ;;  %1766 = vmatprep.subr.bf16.mxu1 %v1920_v0 }
 0x1d4   : > { %v1106_v14 = vpack.c.bf16 %v1042_v13, %v1041_v12 }
 0x1d6   : > { %1767 = vmatpush3.bf16.msra.mxu1 %v1106_v14 }
 0x1d7   : > { %v1056_v17 = vpop.permute.xlu0 %1055 }
 0x1d9   : > { %1769 = vmatmul.mubr.bf16.vlgmr.msra.gmra.mrb[8].mxu1 %v1098_v15 }
 0x1df   : > { %v1111_v43 = vpop.permute.xlu1 %1110 }
 0x28c   : > { %v1092_v20 = vpop.f32.mrb[0].mxu0 }
 0x28d   : > { %v1093_v21 = vadd.f32 %v1092_v20, %v1056_v17  ;;  %v1750_v22 = vpop.f32.mrb[1].mxu0 }
 0x28e   : > { %v1095_v23 = vpop.f32.mrb[2].mxu0 }
 0x28f   : > { %v1751_v25 = vpop.f32.mrb[3].mxu0  ;;  %v1156_v27 = vrot.slane %v1093_v21, %v2129_v18  ;;  %v1167_v29 = vrot.slane %v1093_v21, %v2132_v19  ;;  %v1178_v31 = vrot.slane %v1093_v21, %v2139_v24  ;;  %v1189_v33 = vrot.slane %v1093_v21, %v2144_v26 }
 0x290   : > { %v1200_v34 = vrot.slane %v1093_v21, %v2149_v28  ;;  %v1211_v36 = vrot.slane %v1093_v21, %v2154_v30  ;;  %v1222_v19 = vrot.slane %v1093_v21, %v2159_v32  ;;  %v1233_v24 = vrot.slane %v1093_v21, %v2164_v35  ;;  %v1843_v30 = vld [vmem:[%s2088_s19 + $0x8] sm:$0xff]   ;;  %v1844_v32 = vld [vmem:[%s2088_s19 + $0x10] sm:$0xff]   ;;  %v1845_v35 = vld [vmem:[%s2088_s19 + $0x18] sm:$0xff]   ;;  %s439_s19 = scalar_select %p438_p7, %s2008_s25, 1 }
 0x291   : > { %1162 = vbcast.lane.b32.xlu1 %v1156_v27, 264  ;;  %1158 = vbcast.lane.b32.xlu0 %v1156_v27, 256 }
 0x292   : > { %1775 = vmatpush3.bf16.msra.mxu0 %v1843_v30  ;;  %s440_s24 = scalar_lea.vmem %s2313_s11, %s439_s19 }
 0x293   : > { %1776 = vmatprep.subr.bf16.mxu0 %v1920_v0 }
 0x295   : > { %1173 = vbcast.lane.b32.xlu1 %v1167_v29, 264  ;;  %1169 = vbcast.lane.b32.xlu0 %v1167_v29, 256 }
 0x296   : > { %1777 = vmatpush3.bf16.msra.mxu0 %v1844_v32 }
 0x297   : > { %1778 = vmatprep.subr.bf16.mxu0 %v1920_v0 }
 0x299   : > { %1184 = vbcast.lane.b32.xlu1 %v1178_v31, 264  ;;  %1180 = vbcast.lane.b32.xlu0 %v1178_v31, 256 }
 0x29a   : > { %1779 = vmatpush3.bf16.msra.mxu0 %v1845_v35 }
 0x29b   : > { %1780 = vmatprep.subr.bf16.mxu0 %v1920_v0 }
 0x29d   : > { %1195 = vbcast.lane.b32.xlu1 %v1189_v33, 264  ;;  %1191 = vbcast.lane.b32.xlu0 %v1189_v33, 256 }
 0x29e   : > { %1781 = vmatpush3.bf16.msra.mxu0 %v1846_v40 }
 0x29f   : > { %1782 = vmatprep.subr.bf16.mxu0 %v1920_v0 }
 0x2a1   : > { %1206 = vbcast.lane.b32.xlu1 %v1200_v34, 264  ;;  %1202 = vbcast.lane.b32.xlu0 %v1200_v34, 256 }
 0x2a2   : > { %1783 = vmatpush3.bf16.msra.mxu0 %v1847_v41 }
 0x2a3   : > { %1784 = vmatprep.subr.bf16.mxu0 %v1920_v0 }
 0x2a5   : > { %1217 = vbcast.lane.b32.xlu1 %v1211_v36, 264  ;;  %1213 = vbcast.lane.b32.xlu0 %v1211_v36, 256 }
 0x2a6   : > { %1785 = vmatpush3.bf16.msra.mxu0 %v1848_v42 }
 0x2a7   : > { %1786 = vmatprep.subr.bf16.mxu0 %v1920_v0 }
 0x2a9   : > { %1228 = vbcast.lane.b32.xlu1 %v1222_v19, 264  ;;  %1224 = vbcast.lane.b32.xlu0 %v1222_v19, 256 }
 0x2aa   : > { %1787 = vmatpush3.bf16.msra.mxu0 %v1849_v60 }
 0x2ac   : > { %v1147_v26 = vpop.f32.mrb[8].mxu1 }
 0x2ad   : > { %1239 = vbcast.lane.b32.xlu1 %v1233_v24, 264  ;;  %1235 = vbcast.lane.b32.xlu0 %v1233_v24, 256  ;;  %v1770_v28 = vpop.f32.mrb[9].mxu1  ;;  %v1148_v44 = vadd.f32 %v1147_v26, %v1111_v43 }
 0x2ae   : > { %v1150_v37 = vpop.f32.mrb[10].mxu1 }
 0x2af   : > { %v1771_v38 = vpop.f32.mrb[11].mxu1  ;;  %v1249_v45 = vrot.slane %v1148_v44, %v2183_v51  ;;  %v1242_v8 = vcombine.high %v1148_v44, %v1148_v44 }
 0x2b1   : > { %v1265_v46 = vrot.slane %v1249_v45, %v2183_v51  ;;  %v1257_v47 = vcombine.high %v1249_v45, %v1249_v45  ;;  %v1256_v14 = vrot.slane %v1242_v8, %v2183_v51 }
 0x2b3   : > { %v1294_v48 = vrot.slane %v1265_v46, %v2129_v18  ;;  %v1279_v49 = vrot.slane %v1257_v47, %v2183_v51  ;;  %v1287_v61 = vcombine.high %v1265_v46, %v1265_v46  ;;  %v1272_v23 = vrot.slane %v1256_v14, %v2183_v51 }
 0x2b4   : > { %v1258_v34 = vcombine.high %v1256_v14, %v1256_v14 }
 0x2b5   : > { %v1298_v56 = vrot.slane %v1279_v49, %v2129_v18  ;;  %v1302_v3 = vrot.slane %v1287_v61, %v2129_v18  ;;  %v1289_v9 = vcombine.high %v1279_v49, %v1279_v49  ;;  %v1310_v33 = vrot.slane %v1272_v23, %v2129_v18 }
 0x2b6   : > { %v1286_v28 = vrot.slane %v1258_v34, %v2183_v51  ;;  %v1288_v43 = vcombine.high %v1272_v23, %v1272_v23 }
 0x2b7   : > { %v1306_v15 = vrot.slane %v1289_v9, %v2129_v18 }
 0x2b8   : > { %v1314_v32 = vrot.slane %v1286_v28, %v2129_v18  ;;  %v1318_v47 = vrot.slane %v1288_v43, %v2129_v18 }
 0x303   : > { %v1159_v50 = vpop.permute.xlu0 %1158  ;;  %v1163_v52 = vpop.permute.xlu1 %1162 }
 0x304   : > { %v1331_v53 = vadd.f32 %v1294_v48, %v1159_v50  ;;  %v1332_v54 = vadd.f32 %v1294_v48, %v1163_v52 }
 0x306   : > { %v1363_v55 = vmul.f32 0.33, %v1331_v53  ;;  %vm1347_vm3 = vcmp.ge.f32.partialorder %v1331_v53, 0.0  ;;  %v1364_v16 = vmul.f32 0.33, %v1332_v54  ;;  %vm1348_vm4 = vcmp.ge.f32.partialorder %v1332_v54, 0.0 }
 0x307   : > { %v1170_v0 = vpop.permute.xlu0 %1169  ;;  %v1174_v59 = vpop.permute.xlu1 %1173 }
 0x308   : > { %v1333_v57 = vadd.f32 %v1298_v56, %v1170_v0  ;;  %v1379_v58 = vsel %vm1347_vm3, %v1331_v53, %v1363_v55  ;;  %v1334_v63 = vadd.f32 %v1298_v56, %v1174_v59  ;;  %v1380_v1 = vsel %vm1348_vm4, %v1332_v54, %v1364_v16 }
 0x309   : > { %1395 = vxpose.xlu0.b32.start [1/16] (narrow) %v1379_v58, 16  ;;  %v1290_v53 = vcombine.high %v1286_v28, %v1286_v28 }
 0x30a   : > { %v1365_v62 = vmul.f32 0.33, %v1333_v57  ;;  %vm1349_vm5 = vcmp.ge.f32.partialorder %v1333_v57, 0.0  ;;  %v1366_v4 = vmul.f32 0.33, %v1334_v63  ;;  %vm1350_vm6 = vcmp.ge.f32.partialorder %v1334_v63, 0.0 }
 0x30b   : > { %v1181_v2 = vpop.permute.xlu0 %1180  ;;  %v1185_v7 = vpop.permute.xlu1 %1184  ;;  %v1322_v16 = vrot.slane %v1290_v53, %v2129_v18 }
 0x30c   : > { %v1335_v5 = vadd.f32 %v1302_v3, %v1181_v2  ;;  %v1381_v6 = vsel %vm1349_vm5, %v1333_v57, %v1365_v62  ;;  %v1336_v11 = vadd.f32 %v1302_v3, %v1185_v7  ;;  %v1382_v12 = vsel %vm1350_vm6, %v1334_v63, %v1366_v4 }
 0x30d   : > { %1396 = vxpose.xlu0.b32.cont [2/16] (narrow) %v1380_v1, 16 }
 0x30e   : > { %v1367_v10 = vmul.f32 0.33, %v1335_v5  ;;  %vm1351_vm7 = vcmp.ge.f32.partialorder %v1335_v5, 0.0  ;;  %v1368_v17 = vmul.f32 0.33, %v1336_v11  ;;  %vm1352_vm8 = vcmp.ge.f32.partialorder %v1336_v11, 0.0 }
 0x30f   : > { %v1192_v13 = vpop.permute.xlu0 %1191  ;;  %v1196_v22 = vpop.permute.xlu1 %1195 }
 0x310   : > { %v1337_v20 = vadd.f32 %v1306_v15, %v1192_v13  ;;  %v1383_v21 = vsel %vm1351_vm7, %v1335_v5, %v1367_v10  ;;  %v1338_v27 = vadd.f32 %v1306_v15, %v1196_v22  ;;  %v1384_v29 = vsel %vm1352_vm8, %v1336_v11, %v1368_v17 }
 0x311   : > { %1397 = vxpose.xlu0.b32.cont [3/16] (narrow) %v1381_v6, 16  ;;  %v1676_v6 = vld [vmem:[%s440_s24] ss:$0 sm:$0xff] }
 0x312   : > { %v1369_v25 = vmul.f32 0.33, %v1337_v20  ;;  %vm1353_vm0 = vcmp.ge.f32.partialorder %v1337_v20, 0.0  ;;  %v1370_v36 = vmul.f32 0.33, %v1338_v27  ;;  %vm1354_vm9 = vcmp.ge.f32.partialorder %v1338_v27, 0.0 }
 0x313   : > { %v1203_v31 = vpop.permute.xlu0 %1202  ;;  %v1207_v26 = vpop.permute.xlu1 %1206 }
 0x314   : > { %v1339_v19 = vadd.f32 %v1310_v33, %v1203_v31  ;;  %v1385_v24 = vsel %vm1353_vm0, %v1337_v20, %v1369_v25  ;;  %v1340_v38 = vadd.f32 %v1310_v33, %v1207_v26  ;;  %v1386_v39 = vsel %vm1354_vm9, %v1338_v27, %v1370_v36 }
 0x315   : > { %1398 = vxpose.xlu0.b32.cont [4/16] (narrow) %v1382_v12, 16 }
 0x316   : > { %v1371_v37 = vmul.f32 0.33, %v1339_v19  ;;  %vm1355_vm10 = vcmp.ge.f32.partialorder %v1339_v19, 0.0  ;;  %v1372_v35 = vmul.f32 0.33, %v1340_v38  ;;  %vm1356_vm11 = vcmp.ge.f32.partialorder %v1340_v38, 0.0 }
 0x317   : > { %v1214_v30 = vpop.permute.xlu0 %1213  ;;  %v1218_v42 = vpop.permute.xlu1 %1217 }
 0x318   : > { %v1341_v40 = vadd.f32 %v1314_v32, %v1214_v30  ;;  %v1387_v41 = vsel %vm1355_vm10, %v1339_v19, %v1371_v37  ;;  %v1342_v45 = vadd.f32 %v1314_v32, %v1218_v42  ;;  %v1388_v46 = vsel %vm1356_vm11, %v1340_v38, %v1372_v35 }
 0x319   : > { %1399 = vxpose.xlu0.b32.cont [5/16] (narrow) %v1383_v21, 16 }
 0x31a   : > { %v1373_v44 = vmul.f32 0.33, %v1341_v40  ;;  %vm1357_vm12 = vcmp.ge.f32.partialorder %v1341_v40, 0.0  ;;  %v1374_v48 = vmul.f32 0.33, %v1342_v45  ;;  %vm1358_vm13 = vcmp.ge.f32.partialorder %v1342_v45, 0.0 }
 0x31b   : > { %v1225_v51 = vpop.permute.xlu0 %1224  ;;  %v1229_v52 = vpop.permute.xlu1 %1228 }
 0x31c   : > { %v1343_v49 = vadd.f32 %v1318_v47, %v1225_v51  ;;  %v1389_v50 = vsel %vm1357_vm12, %v1341_v40, %v1373_v44  ;;  %v1344_v55 = vadd.f32 %v1318_v47, %v1229_v52  ;;  %v1390_v56 = vsel %vm1358_vm13, %v1342_v45, %v1374_v48 }
 0x31d   : > { %1400 = vxpose.xlu0.b32.cont [6/16] (narrow) %v1384_v29, 16 }
 0x31e   : > { %v1375_v54 = vmul.f32 0.33, %v1343_v49  ;;  %vm1359_vm14 = vcmp.ge.f32.partialorder %v1343_v49, 0.0  ;;  %v1376_v57 = vmul.f32 0.33, %v1344_v55  ;;  %vm1360_vm15 = vcmp.ge.f32.partialorder %v1344_v55, 0.0 }
 0x31f   : > { %v1236_v0 = vpop.permute.xlu0 %1235  ;;  %v1240_v60 = vpop.permute.xlu1 %1239 }
 0x320   : > { %v1345_v58 = vadd.f32 %v1322_v16, %v1236_v0  ;;  %v1391_v59 = vsel %vm1359_vm14, %v1343_v49, %v1375_v54  ;;  %v1346_v62 = vadd.f32 %v1322_v16, %v1240_v60  ;;  %v1392_v63 = vsel %vm1360_vm15, %v1344_v55, %v1376_v57 }
 0x321   : > { %1401 = vxpose.xlu0.b32.cont [7/16] (narrow) %v1385_v24, 16 }
 0x322   : > { %v1377_v61 = vmul.f32 0.33, %v1345_v58  ;;  %vm1361_vm1 = vcmp.ge.f32.partialorder %v1345_v58, 0.0  ;;  %v1378_v1 = vmul.f32 0.33, %v1346_v62  ;;  %vm1362_vm2 = vcmp.ge.f32.partialorder %v1346_v62, 0.0 }
 0x324   : > { %v1393_v2 = vsel %vm1361_vm1, %v1345_v58, %v1377_v61  ;;  %v1394_v3 = vsel %vm1362_vm2, %v1346_v62, %v1378_v1 }
 0x325   : > { %1402 = vxpose.xlu0.b32.cont [8/16] (narrow) %v1386_v39, 16 }
 0x329   : > { %1403 = vxpose.xlu0.b32.cont [9/16] (narrow) %v1387_v41, 16 }
 0x32d   : > { %1404 = vxpose.xlu0.b32.cont [10/16] (narrow) %v1388_v46, 16 }
 0x331   : > { %1405 = vxpose.xlu0.b32.cont [11/16] (narrow) %v1389_v50, 16 }
 0x335   : > { %1406 = vxpose.xlu0.b32.cont [12/16] (narrow) %v1390_v56, 16 }
 0x339   : > { %1407 = vxpose.xlu0.b32.cont [13/16] (narrow) %v1391_v59, 16 }
 0x33d   : > { %1408 = vxpose.xlu0.b32.cont [14/16] (narrow) %v1392_v63, 16 }
 0x341   : > { %1409 = vxpose.xlu0.b32.cont [15/16] (narrow) %v1393_v2, 16 }
 0x345   : > { %1410 = vxpose.xlu0.b32.end [16/16] (narrow) %v1394_v3, 16 }
 0x389   : > { %v1411_v18 = vpop.trf.xlu0 }
 0x38d   : > { %v1412_v4 = vpop.trf.xlu0 }
 0x38e   : > { %v1427_v5 = vpack.c.bf16 %v1412_v4, %v1411_v18 }
 0x390   : > { %1789 = vmatmul.mubr.bf16.vlgmr.msra.gmra.mrb[4].mxu0 %v1427_v5 }
 0x463   : > { %v1533_v7 = vpop.f32.mrb[4].mxu0 }
 0x464   : > { %v1534_v8 = vadd.f32 %v1676_v6, %v1533_v7  ;;  %v1790_v9 = vpop.f32.mrb[5].mxu0 }
 0x465   : > { %v1536_v10 = vpop.f32.mrb[6].mxu0  ;;  %1554 = sbr.rel (!%p2320_p9) target bundleno = 1140 (0x474), region = 76 }
 0x466   : > { %vm1540_vm3 = vcmp.ge.f32.partialorder %v1534_v8, 0.0  ;;  %v1542_v11 = vmul.f32 0.33, %v1534_v8  ;;  %v1537_v12 = vadd.f32 %v1676_v6, %v1536_v10  ;;  %v1791_v13 = vpop.f32.mrb[7].mxu0 }
 0x468   : > { %v1544_v14 = vsel %vm1540_vm3, %v1534_v8, %v1542_v11  ;;  %vm1541_vm4 = vcmp.ge.f32.partialorder %v1537_v12, 0.0  ;;  %v1543_v15 = vmul.f32 0.33, %v1537_v12 }
 0x469   : > { %1546 = vst [vmem:[%s437_s13] sm:$0xff] %v1544_v14 }
 0x46a   : > { %v1545_v17 = vsel %vm1541_vm4, %v1537_v12, %v1543_v15 }
 0x46b   : > { %1547 = vst [vmem:[%s437_s13 + $0x8] sm:$0xff] %v1545_v17 }
 0x470   : > { %v1586_v20 = vld [vmem:[%s437_s13] sm:$0xff] }
 0x471   : > { %1587 = vst [vmem:[%s1556_s28] sm:$0xff] %v1586_v20 }
 0x472   : > { %v1588_v21 = vld [vmem:[%s437_s13 + $0x8] sm:$0xff] }
 0x473   : > { %1589 = vst [vmem:[%s1556_s28 + $0x10] sm:$0xff] %v1588_v21 }
 0x474 PF: > { %s2321_s18 = sld [smem:[#allocation6_spill]]  ;;  %p22_p10 = scmp.ge.s32.totalorder %s2011_s26, 4  }
 0x475   : > { %s2322_s21 = smov %s1906_s22  ;;  %s2323_s22 = smov %s1910_s23 }
 0x476   : > { %s2325_s24 = smov %s2011_s26  ;;  %24 = sbr.rel (!%p22_p10) target bundleno = 3 (0x3), region = 149 }
 0x47a   : > { %s2324_s23 = smov %s2321_s18 }
 0x47d   :  { %1605 = vsyncpa [#allocation3], 1 }
 0x47e   :  { %1607 = vsyncpa [#allocation3 + $0x1], 1 }

</bundles_post_ra>
